<compile_context>
chip_gen: v6e
topology: v6e:2x2x1
jax: 0.10.0
libtpu: 0.0.40
codegen_flags: <defaults>
</compile_context>

<pallas_src>
import math
import functools

import jax
import jax.numpy as jnp
from jax import lax
from jax.experimental import pallas as pl
from jax.experimental.pallas import tpu as pltpu


def make_pe_table(max_len: int, d_model: int, dtype=jnp.float32) -> jnp.ndarray:
    """Sin/cos positional-encoding table, identical math to the PyTorch
    __init__ (register_buffer 'pe'), shape (max_len, d_model)."""
    position = jnp.arange(0.0, max_len, dtype=jnp.float32)[:, None]           # (L, 1)
    div_term = jnp.exp(
        jnp.arange(0.0, d_model, 2.0, dtype=jnp.float32)
        * (-(math.log(10000.0) / d_model))
    )                                                                          # (D/2,)
    angles = position * div_term                                               # (L, D/2)
    pe = jnp.zeros((max_len, d_model), dtype=jnp.float32)
    pe = pe.at[:, 0::2].set(jnp.sin(angles))
    pe = pe.at[:, 1::2].set(jnp.cos(angles))
    return pe.astype(dtype)


def _hash_u32(x):
    """murmur3-style 32-bit finalizer (uint32 in / uint32 out)."""
    x = x ^ (x >> 16)
    x = x * jnp.uint32(0x7FEB352D)
    x = x ^ (x >> 15)
    x = x * jnp.uint32(0x846CA68B)
    x = x ^ (x >> 16)
    return x


def _pe_dropout_kernel(seed_ref, x_ref, pe_ref, o_ref, *,
                       p: float, training: bool,
                       tile_rows: int, lanes: int, rows_total: int):
    # x_ref / pe_ref / o_ref blocks are all (1, tile_rows, lanes):
    # matching block shapes -> plain vreg add, no broadcast materialization.
    y = x_ref[...] + pe_ref[...]

    if training and p > 0.0:
        b = pl.program_id(0).astype(jnp.uint32)
        r = pl.program_id(1).astype(jnp.uint32)
        seed = seed_ref[0].astype(jnp.uint32)

        shape = y.shape                                   # (1, TR, C)
        row = lax.broadcasted_iota(jnp.int32, shape, 1).astype(jnp.uint32)
        lane = lax.broadcasted_iota(jnp.int32, shape, 2).astype(jnp.uint32)
        # Global element counter (unique per element across the whole array).
        gidx = ((b * jnp.uint32(rows_total)
                 + r * jnp.uint32(tile_rows)
                 + row) * jnp.uint32(lanes) + lane)
        h = _hash_u32(gidx * jnp.uint32(0x9E3779B1)
                      + seed * jnp.uint32(0x85EBCA77)
                      + jnp.uint32(1))
        # 31 random bits -> signed integer threshold compare (no float convert,
        # no shift-to-[0,1) arithmetic; portable unsigned-free comparison).
        r31 = (h & jnp.uint32(0x7FFFFFFF)).astype(jnp.int32)
        thresh = jnp.int32(min(int(p * float(1 << 31)), (1 << 31) - 1))
        keep = r31 >= thresh
        scale = jnp.asarray(1.0 / (1.0 - p), dtype=y.dtype)
        y = jnp.where(keep, y * scale, jnp.zeros((), dtype=y.dtype))

    o_ref[...] = y.astype(o_ref.dtype)


def _pick_tile_rows(rows: int, row_bytes: int, target_bytes: int = 2 << 20) -> int:
    """Largest divisor of `rows` that is a multiple of 8 and keeps one buffer
    around `target_bytes` (sized for v7x's 64 MiB VMEM with deep pipelining)."""
    max_rows = max(8, target_bytes // max(row_bytes, 1))
    if rows <= max_rows:
        return rows
    t = (max_rows // 8) * 8
    while t >= 8:
        if rows % t == 0:
            return t
        t -= 8
    return rows  # no nice divisor; fall back to one full-row block


def positional_encoding_forward(x, pe_table, *, p: float, training: bool, seed: int = 0):
    """x: (B, S, D). Returns dropout(x + pe[:S]) with the PyTorch module's semantics."""
    B, S, D = x.shape
    if training and p >= 1.0:
        # torch.nn.Dropout(p=1.0) zeroes everything; avoid 1/(1-p) blow-up.
        return jnp.zeros_like(x)

    pe = pe_table[:S].astype(x.dtype)                # align dtypes up front

    # Lane-dense layout: flatten (S, D) and re-chop into 128-wide lanes when
    # possible; otherwise keep (S, D) with the full D as the (untiled) last dim.
    N = S * D
    LANES = 128
    if N % LANES == 0:
        rows, cols = N // LANES, LANES
    else:
        rows, cols = S, D

    x3 = x.reshape(B, rows, cols)
    pe3 = pe.reshape(1, rows, cols)

    itemsize = jnp.dtype(x.dtype).itemsize
    tr = _pick_tile_rows(rows, cols * itemsize)
    grid = (B, rows // tr)

    seed_arr = jnp.array([seed], dtype=jnp.int32)
    kernel = functools.partial(
        _pe_dropout_kernel, p=float(p), training=bool(training),
        tile_rows=tr, lanes=cols, rows_total=rows)

    out = pl.pallas_call(
        kernel,
        out_shape=jax.ShapeDtypeStruct((B, rows, cols), x.dtype),
        grid_spec=pltpu.PrefetchScalarGridSpec(
            num_scalar_prefetch=1,                       # RNG seed -> SMEM
            grid=grid,                                   # (batch, row-tiles)
            in_specs=[
                pl.BlockSpec((1, tr, cols), lambda b, r, seed: (b, r, 0)),   # x
                pl.BlockSpec((1, tr, cols), lambda b, r, seed: (0, r, 0)),   # pe
            ],
            out_specs=pl.BlockSpec((1, tr, cols), lambda b, r, seed: (b, r, 0)),
        ),
        compiler_params=pltpu.CompilerParams(
            dimension_semantics=("parallel", "parallel"),  # shard across TCs on v7x
        ),
    )(seed_arr, x3, pe3)

    return out.reshape(B, S, D)


if __name__ == "__main__":
    # Small config consistent with the module's forward pass.
    d_model = 32
    dropout_p = 0.1
    max_len = 64
    batch, seq = 2, 8

    # Deterministic "parameters": the sin/cos PE buffer.
    pe_table = make_pe_table(max_len, d_model)

    # Deterministic example input.
    key = jax.random.PRNGKey(0)
    x = jax.random.normal(key, (batch, seq, d_model), dtype=jnp.float32)

    ref = x + pe_table[:seq][None, :, :]

    # Eval mode: dropout is identity.
    y_eval = positional_encoding_forward(x, pe_table, p=dropout_p, training=False)
    y_eval = jax.block_until_ready(y_eval)
    assert jnp.allclose(y_eval, ref, atol=1e-5, rtol=1e-5)

    # Training mode: inverted dropout (stateless hash-based mask).
    # TODO(synk): RNG stream intentionally differs from torch.nn.Dropout's.
    y_train = positional_encoding_forward(
        x, pe_table, p=dropout_p, training=True, seed=1234)
    y_train = jax.block_until_ready(y_train)
    assert y_train.shape == (batch, seq, d_model)
    # Every kept element equals (x + pe)/(1-p); dropped elements are exactly 0.
    scaled = ref / (1.0 - dropout_p)
    ok = jnp.all((y_train == 0.0) | jnp.isclose(y_train, scaled, atol=1e-5, rtol=1e-5))
    assert bool(ok)

    print("KERNEL_OK")
</pallas_src>

<mosaic_0001>
module attributes {stable_mosaic.version = 11 : i64} {
  func.func @_pe_dropout_kernel(%arg0: i32, %arg1: i32, %arg2: memref<1xi32, #tpu.memory_space<smem>>, %arg3: memref<1x2x128xf32, #tpu.memory_space<vmem>>, %arg4: memref<1x2x128xf32, #tpu.memory_space<vmem>>, %arg5: memref<1x2x128xf32, #tpu.memory_space<vmem>>) attributes {dimension_semantics = [#tpu.dimension_semantics<parallel>, #tpu.dimension_semantics<parallel>], iteration_bounds = array<i64: 2, 1>, scalar_prefetch = 1 : i64, scratch_operands = 0 : i64, tpu.core_type = #tpu.core_type<tc>, window_params = [{transform_indices = @transform_0, window_bounds = array<i64: 1, 2, 128>}, {transform_indices = @transform_1, window_bounds = array<i64: 1, 2, 128>}, {transform_indices = @transform_2, window_bounds = array<i64: 1, 2, 128>}]} {
    %c0 = arith.constant 0 : index
    %c0_0 = arith.constant 0 : index
    %c0_1 = arith.constant 0 : index
    %0 = vector.load %arg3[%c0, %c0_0, %c0_1] : memref<1x2x128xf32, #tpu.memory_space<vmem>>, vector<1x2x128xf32>
    %c0_2 = arith.constant 0 : index
    %c0_3 = arith.constant 0 : index
    %c0_4 = arith.constant 0 : index
    %1 = vector.load %arg4[%c0_2, %c0_3, %c0_4] : memref<1x2x128xf32, #tpu.memory_space<vmem>>, vector<1x2x128xf32>
    %2 = arith.addf %0, %1 : vector<1x2x128xf32>
    %c0_5 = arith.constant 0 : index
    %c0_6 = arith.constant 0 : index
    %c0_7 = arith.constant 0 : index
    %3 = vector.load %arg5[%c0_5, %c0_6, %c0_7] : memref<1x2x128xf32, #tpu.memory_space<vmem>>, vector<1x2x128xf32>
    tpu.vector_store %arg5[%c0_5, %c0_6, %c0_7], %2 {strides = array<i32>} : memref<1x2x128xf32, #tpu.memory_space<vmem>>, vector<1x2x128xf32>,
    return
  }
  func.func @transform_0(%arg0: i32, %arg1: i32, %arg2: memref<1xi32, #tpu.memory_space<smem>>) -> (i32, i32, i32) {
    %c0_i32 = arith.constant 0 : i32
    %c0_i32_0 = arith.constant 0 : i32
    return %arg0, %arg1, %c0_i32 : i32, i32, i32
  }
  func.func @transform_1(%arg0: i32, %arg1: i32, %arg2: memref<1xi32, #tpu.memory_space<smem>>) -> (i32, i32, i32) {
    %c0_i32 = arith.constant 0 : i32
    %c0_i32_0 = arith.constant 0 : i32
    %c0_i32_1 = arith.constant 0 : i32
    return %c0_i32, %arg1, %c0_i32_0 : i32, i32, i32
  }
  func.func @transform_2(%arg0: i32, %arg1: i32, %arg2: memref<1xi32, #tpu.memory_space<smem>>) -> (i32, i32, i32) {
    %c0_i32 = arith.constant 0 : i32
    %c0_i32_0 = arith.constant 0 : i32
    return %arg0, %arg1, %c0_i32 : i32, i32, i32
  }
}

</mosaic_0001>

<bundles_post_ra>
// kernel: tpu_custom_call.1
= control target key start
LH: loop header
LB: loop body
LE: loop exit
PB: predicated region body
PF: predicated region fallthrough
CT: control target
= control target key end

     0   :  { %9 = vsyncpa [#allocation5], 0  ;;  %s654_s0 = inlined_call_operand.<no memory space> [shape: s32[1], index: 0, kind: input, shape index: {}]   ;;  %s655_s1 = inlined_call_operand.hbm [shape: f32[2,2,128], index: 1, kind: input, shape index: {}]   ;;  %s656_s2 = inlined_call_operand.vmem [shape: f32[1,2,128], index: 2, kind: input, shape index: {}]   ;;  %s657_s3 = inlined_call_operand.hbm [shape: f32[2,2,128], index: 3, kind: output, shape index: {}]  }
   0x1   :  { %11 = vsyncpa [#allocation5 + $0x1], 0 }
   0x2   :  { %12 = vsyncpa [#allocation6], 0 }
   0x3   :  { %14 = vsyncpa [#allocation6 + $0x1], 0  ;;  %s517_s12 = smov 0   ;;  %s519_s13 = smov 0  }
   0x4   :  { %s521_s14 = smov 0   ;;  %s523_s0 = smov 0  }
   0x5   :  { %s525_s15 = smov 0   ;;  %s527_s16 = smov 0  }
   0x6 LB: > { %s309_s17 = sadd.s32 4294967295, %s493_s16   ;;  %s310_s18 = sadd.s32 4294967294, %s493_s16   ;;  %s493_s16 = sphi %s527_s16, %s20_s16   ;;  %s489_s15 = sphi %s525_s15, %s669_s15   ;;  %s485_s0 = sphi %s523_s0, %s668_s0   ;;  %s481_s14 = sphi %s521_s14, %s667_s14   ;;  %s477_s13 = sphi %s519_s13, %s666_s13   ;;  %s473_s12 = sphi %s517_s12, %s665_s12  }
   0x7   : > { %s32_s19 = sadd.s32 1, %s489_s15  ;;  %s41_s20 = sadd.s32 1, %s481_s14 }
   0x8   : > { %p34_p0 = scmp.ge.s32.totalorder %s32_s19, 2  ;;  %p48_p1 = scmp.ne.s32.totalorder %s481_s14, %s477_s13 }
   0x9   : > { %p49_p2 = scmp.eq.s32.totalorder %s493_s16, 0  ;;  %p54_p3 = scmp.ne.s32.totalorder %s477_s13, %s473_s12 }
   0xa   : > { %s671_s19 = smov (%p34_p0, %s32_s19), 0  ;;  %p55_p5 = scmp.eq.s32.totalorder %s309_s17, 0 }
   0xb   : > { %p558_p4 = por %p49_p2, %p48_p1  ;;  %s36_s22 = ssub.s32 %s489_s15, %s671_s19 }
   0xc   : > { %p106_p6 = scmp.eq.s32.totalorder %s309_s17, 1  ;;  %p39_p7 = scmp.eq.s32.totalorder %s36_s22, 0 }
   0xd   : > { %p564_p8 = por %p55_p5, %p54_p3  ;;  %p112_p10 = scmp.eq.s32.totalorder %s310_s18, 1 }
   0xe   : > { %p568_p9 = por %p106_p6, %p48_p1  ;;  %p335_p13 = scmp.lt.s32.totalorder %s493_s16, 2 }
   0xf   : > { %s573_s25 = scalar_select %p39_p7, %s481_s14, %s41_s20  }
  0x10   : > { %p575_p11 = por %p112_p10, %p54_p3  ;;  %s139_s27 = sand.u32 1, %s481_s14  }
  0x11   : > { %s314_s28 = sshll.u32 %s139_s27, 1  ;;  %s315_s29 = sshll.u32 %s489_s15, 5 }
  0x12   : > { %s661_s26 = scalar_select %p575_p11, 1, 0 }
  0x13   : > { %s149_s5 = scalar_lea.hbm %s655_s1, %s315_s29  ;;  %s143_s6 = scalar_lea.vmem [#allocation4], %s314_s28 }
  0x14   : > { %s151_s7 = sshll.u32 %s143_s6, 4  ;;  %p588_p0 = pnand %p335_p13, %p558_p4  ;;  %s152_s7 = int_to_ptr.vmem [resolvable:$true] %s151_s7 }
  0x15   : > { %p316_p1 = scmp.ge.s32.totalorder %s493_s16, 1  ;;  %p156_p2 = scmp.lt.s32.totalorder %s493_s16, 3 }
  0x16   : > { %s140_s9 = scalar_lea.sflag [#allocation5], %s139_s27  ;;  %p387_p3 = pneg %p588_p0 }
  0x17   : > { %s398_s10 = scalar_lea.vmem %s152_s7, 32  ;;  %s495_s11 = smov [#allocation4]  }
  0x18   : > { %p399_p5 = scmp.ne.s32.totalorder %s152_s7, %s398_s10  ;;  %s403_s17 = sshll.u32 %s495_s11, 4  ;;  %s404_s17 = int_to_ptr.vmem [resolvable:$false] %s403_s17 }
  0x19   : > { %s405_s18 = scalar_lea.vmem %s404_s17, 64  ;;  %p406_p10 = scmp.lt.s32.totalorder %s152_s7, %s404_s17 }
  0x1a   : > { %p401_p6 = pnand %p399_p5, %p387_p3  ;;  %p407_p12 = scmp.lt.s32.totalorder %s405_s18, %s398_s10 }
  0x1c   : > { %p402_p7 = pneg %p401_p6  ;;  %p408_p4 = por %p407_p12, %p406_p10 }
  0x1e   : > { %p409_p13 = pnand %p408_p4, %p402_p7 }
  0x20   : > { %412 = shalt.err (!%p409_p13)
}
  0x21   : > { %330 = dma.hbm_to_vmem [thread:$0]  (!%p588_p0), %s149_s5, 32, %s152_s7, %s140_s9  }
  0x22   : > { %p157_p11 = pnand %p316_p1, %p156_p2 }
  0x23   : > { %s603_s20 = sand.u32 (!%p157_p11), 1, %s477_s13  }
  0x24   : > { %160 = sbr.rel (%p157_p11) target bundleno = 66 (0x42), region = 28  ;;  %s317_s21 = sshll.u32 (!%p157_p11), %s603_s20, 1 }
  0x25   : > { %s163_s22 = scalar_lea.sflag (!%p157_p11), [#allocation5], %s603_s20  ;;  %s166_s27 = scalar_lea.vmem (!%p157_p11), [#allocation4], %s317_s21 }
  0x29   : > { %464 = dma.done.wait (%p564_p8), %s163_s22, 32  }
  0x2a   : > { %466 = vsyncadd (%p564_p8), %s163_s22, 4294967264  ;;  %s190_s28 = scalar_lea.vmem [#allocation7], %s317_s21  ;;  %s320_s30 = sshll.u32 %s485_s0, 5  ;;  %v195_v0 = vld [vmem:[%s166_s27] sm:$0x3] }
  0x2b   : > { %s214_s29 = sshll.u32 %s190_s28, 4  ;;  %v196_v1 = vld [vmem:[%s656_s2] sm:$0x3]  ;;  %s212_s8 = scalar_lea.hbm %s657_s3, %s320_s30  ;;  %s215_s29 = int_to_ptr.vmem [resolvable:$true] %s214_s29 }
  0x2c   : > { %v197_v2 = vadd.f32 %v196_v1, %v195_v0  ;;  %s200_s23 = scalar_lea.sflag [#allocation6], %s603_s20  ;;  %s413_s9 = scalar_lea.vmem %s215_s29, 32 }
  0x2d   : > { %p414_p8 = scmp.ne.s32.totalorder %s215_s29, %s413_s9  ;;  %s496_s10 = smov [#allocation7]  }
  0x2e   : > { %198 = vst [vmem:[%s190_s28] sm:$0x3] %v197_v2  ;;  %s417_s0 = sshll.u32 %s496_s10, 4  ;;  %s418_s0 = int_to_ptr.vmem [resolvable:$false] %s417_s0 }
  0x2f   : > { %p415_p11 = pnand %p414_p8, %p568_p9  ;;  %s419_s11 = scalar_lea.vmem %s418_s0, 64 }
  0x30   : > { %p420_p0 = scmp.lt.s32.totalorder %s215_s29, %s418_s0  ;;  %p421_p1 = scmp.lt.s32.totalorder %s419_s11, %s413_s9 }
  0x31   : > { %p416_p12 = pneg %p415_p11 }
  0x32   : > { %p422_p2 = por %p421_p1, %p420_p0 }
  0x34   : > { %p423_p3 = pnand %p422_p2, %p416_p12 }
  0x36   : > { %426 = shalt.err (!%p423_p3)
}
  0x37   : > { %s427_s17 = scalar_lea.hbm %s212_s8, 32  ;;  %s431_s21 = scalar_lea.hbm %s657_s3, 64 }
  0x38   : > { %p428_p5 = scmp.ne.s32.totalorder %s212_s8, %s427_s17  ;;  %p432_p10 = scmp.lt.s32.totalorder %s212_s8, %s657_s3 }
  0x39   : > { %p433_p4 = scmp.lt.s32.totalorder %s431_s21, %s427_s17 }
  0x3a   : > { %p429_p6 = pnand %p428_p5, %p568_p9 }
  0x3b   : > { %p434_p13 = por %p433_p4, %p432_p10 }
  0x3c   : > { %p430_p7 = pneg %p429_p6 }
  0x3e   : > { %p435_p8 = pnand %p434_p13, %p430_p7 }
  0x40   : > { %438 = shalt.err (!%p435_p8)
}
  0x41   : > { %325 = dma.vmem_to_hbm [thread:$0]  (%p568_p9), %s215_s29, 32, %s212_s8, %s200_s23  }
  0x42 PF: > { %s226_s28 = sand.u32 1, %s473_s12   ;;  %p663_p11 = scmp.ne.s32.totalorder %s661_s26, 0 }
  0x43   : > { %p664_p12 = scmp.ge.s32.totalorder %s493_s16, 2  ;;  %s227_s30 = scalar_lea.sflag [#allocation6], %s226_s28 }
  0x45   : > { %p332_p0 = pnand %p664_p12, %p663_p11 }
  0x47   : > { %p333_p1 = pneg %p332_p0 }
  0x49   : > { %468 = dma.done.wait (%p333_p1), %s227_s30, 32  }
  0x4a   : > { %470 = vsyncadd (%p333_p1), %s227_s30, 4294967264  ;;  %s20_s16 = sadd.s32 1, %s493_s16   ;;  %s665_s12 = smov %s477_s13 }
  0x4b   : > { %p17_p2 = scmp.ge.s32.totalorder %s20_s16, 4   ;;  %s666_s13 = smov %s481_s14 }
  0x4c   : > { %s667_s14 = smov %s573_s25  ;;  %s668_s0 = smov %s489_s15 }
  0x4d   : > { %s669_s15 = smov %s671_s19  ;;  %19 = sbr.rel (!%p17_p2) target bundleno = 6 (0x6), region = 76 }
  0x52   :  { %232 = vsyncpa [#allocation5], 1 }
  0x53   :  { %234 = vsyncpa [#allocation5 + $0x1], 1 }
  0x54   :  { %235 = vsyncpa [#allocation6], 1 }
  0x55   :  { %237 = vsyncpa [#allocation6 + $0x1], 1 }

</bundles_post_ra>
